<compile_context>
chip_gen: v7x
topology: tpu7x:2x2x1
jax: 0.10.0
libtpu: 0.0.40
codegen_flags: <defaults>
</compile_context>

<pallas_src>
import functools

import jax
import jax.numpy as jnp
from jax.experimental import pallas as pl
from jax.experimental.pallas import tpu as pltpu


def _round_up(x: int, m: int) -> int:
    return (x + m - 1) // m * m


def mlp_kernel(x_ref, w1_ref, b1_ref, w2_ref, b2_ref, o_ref):
    # fc1: (tile_b, d_in) bf16 @ (d_in, h_pad) bf16 -> f32 on the MXU.
    # K = d_in is left unpadded; the MXU handles K < 128 internally.
    h = jnp.dot(x_ref[...], w1_ref[...], preferred_element_type=jnp.float32)
    # bias + ReLU in f32 on the VPU (works on all of v5e/v6e/v7x).
    h = jnp.maximum(h + b1_ref[...], 0.0)
    # fc2: (tile_b, h_pad) bf16 @ (h_pad, n_pad) bf16 -> f32; lane-dense output.
    out = jnp.dot(h.astype(jnp.bfloat16), w2_ref[...],
                  preferred_element_type=jnp.float32)
    o_ref[...] = (out + b2_ref[...]).astype(o_ref.dtype)


def prepare_params(w1, b1, w2, b2):
    """One-time prep (call at init, NOT per forward): pad the lane dims of the
    weights/biases to multiples of 128 and cast the matmul operands to bf16.
    Weights are (in, out), i.e. transposed vs. torch nn.Linear.weight."""
    d_in, hidden = w1.shape
    out_size = w2.shape[1]
    h_pad = _round_up(hidden, 128)
    n_pad = _round_up(out_size, 128)

    w1_p = jnp.pad(jnp.asarray(w1), ((0, 0), (0, h_pad - hidden))).astype(jnp.bfloat16)
    b1_p = jnp.pad(jnp.asarray(b1, jnp.float32).reshape(1, hidden),
                   ((0, 0), (0, h_pad - hidden)))
    w2_p = jnp.pad(jnp.asarray(w2),
                   ((0, h_pad - hidden), (0, n_pad - out_size))).astype(jnp.bfloat16)
    b2_p = jnp.pad(jnp.asarray(b2, jnp.float32).reshape(1, out_size),
                   ((0, 0), (0, n_pad - out_size)))
    return (w1_p, b1_p, w2_p, b2_p)


@functools.partial(jax.jit, static_argnames=("out_size", "tile_b"))
def _forward_padded(x, w1_p, b1_p, w2_p, b2_p, *, out_size, tile_b):
    B, d_in = x.shape
    h_pad = w1_p.shape[1]
    n_pad = w2_p.shape[1]

    # Batch tiling: multiples of 16 (bf16 packs 2 rows per sublane).  Cap the
    # tile so the grid has >= 2 tiles whenever the batch allows it, so the
    # "parallel" axis can be sharded across v7x's two TensorCores.
    b_min = _round_up(B, 16)
    tb = max(16, min(_round_up(tile_b, 16), b_min))
    if b_min >= 32:
        tb = min(tb, _round_up(b_min // 2, 16))
    b_pad = _round_up(b_min, tb)
    grid = (b_pad // tb,)

    # Hot path only touches the activation: pad batch rows (if needed) and
    # cast to bf16 in one fused XLA op.  K is left at d_in (no K-pad copy).
    x_p = x.astype(jnp.bfloat16)
    if b_pad != B:
        x_p = jnp.pad(x_p, ((0, b_pad - B), (0, 0)))

    # Rough per-core VMEM footprint; only raise the scoped limit if a very
    # large tile would exceed v5e's 16 MiB default.
    est_vmem = (2 * tb * d_in * 2              # x, double-buffered bf16
                + 2 * tb * n_pad * 2           # out, double-buffered bf16
                + 2 * tb * h_pad * 4           # fc1 activation headroom (f32)
                + 2 * (d_in * h_pad + h_pad * n_pad) * 2   # weights (2 buffers)
                + 2 * (h_pad + n_pad) * 4)                 # biases
    vmem_limit = None
    if est_vmem > 12 * 1024 * 1024:
        vmem_limit = min(2 * est_vmem, 96 * 1024 * 1024)

    out_p = pl.pallas_call(
        mlp_kernel,
        out_shape=jax.ShapeDtypeStruct((b_pad, n_pad), jnp.bfloat16),
        grid=grid,
        in_specs=[
            # x: tiled along batch; last dim == full array dim (no 128 pad).
            pl.BlockSpec((tb, d_in), lambda i: (i, 0)),
            # Weights / biases: constant index_map -> fetched to VMEM once and
            # held resident across all batch tiles.
            pl.BlockSpec((d_in, h_pad), lambda i: (0, 0)),
            pl.BlockSpec((1, h_pad), lambda i: (0, 0)),
            pl.BlockSpec((h_pad, n_pad), lambda i: (0, 0)),
            pl.BlockSpec((1, n_pad), lambda i: (0, 0)),
        ],
        out_specs=pl.BlockSpec((tb, n_pad), lambda i: (i, 0)),
        compiler_params=pltpu.CompilerParams(
            # batch tiles are independent -> shard across TCs on v7x.
            dimension_semantics=("parallel",),
            vmem_limit_bytes=vmem_limit,
        ),
    )(x_p, w1_p, b1_p, w2_p, b2_p)

    # Slice padded rows / lanes off and restore f32 logits.  Under the same
    # jit this is a single small copy, not a second pass over the padded slab.
    return out_p[:B, :out_size].astype(jnp.float32)


def text_classifier_forward(x, params, out_size, *, tile_b: int = 1024):
    """x: (B, input_size) f32; params from prepare_params.
    Returns (B, output_size) f32 logits (same forward as the torch module)."""
    return _forward_padded(x, *params, out_size=out_size, tile_b=tile_b)


def init_params(key, input_size, hidden_size, output_size):
    """Deterministic init mimicking nn.Linear's uniform(-1/sqrt(fan_in), ...)."""
    k1, k2, k3, k4 = jax.random.split(key, 4)
    bound1 = 1.0 / jnp.sqrt(jnp.float32(input_size))
    bound2 = 1.0 / jnp.sqrt(jnp.float32(hidden_size))
    # Stored as (in, out) so the kernel computes x @ W (== x @ torch_weight.T).
    w1 = jax.random.uniform(k1, (input_size, hidden_size), jnp.float32,
                            minval=-bound1, maxval=bound1)
    b1 = jax.random.uniform(k2, (1, hidden_size), jnp.float32,
                            minval=-bound1, maxval=bound1)
    w2 = jax.random.uniform(k3, (hidden_size, output_size), jnp.float32,
                            minval=-bound2, maxval=bound2)
    b2 = jax.random.uniform(k4, (1, output_size), jnp.float32,
                            minval=-bound2, maxval=bound2)
    return w1, b1, w2, b2


if __name__ == "__main__":
    # Small shapes consistent with the module:
    # batch=8, input_size=32 (feature dim of X_train), hidden=128, 4 classes.
    batch, input_size, hidden_size, output_size = 8, 32, 128, 4

    key = jax.random.PRNGKey(0)
    kx, kp = jax.random.split(key)
    x = jax.random.normal(kx, (batch, input_size), jnp.float32)
    w1, b1, w2, b2 = init_params(kp, input_size, hidden_size, output_size)

    # One-time weight prep (padding + bf16 cast) -- off the per-call hot path.
    params = prepare_params(w1, b1, w2, b2)

    logits = text_classifier_forward(x, params, output_size)
    logits = jax.block_until_ready(logits)
    assert logits.shape == (batch, output_size)
    assert logits.dtype == jnp.float32

    # Tight check vs. a JAX reference using the same precision recipe as the
    # kernel (bf16 matmul operands, f32 accumulation, bf16 output store).
    h_ref = jnp.dot(x.astype(jnp.bfloat16), w1.astype(jnp.bfloat16),
                    preferred_element_type=jnp.float32) + b1
    h_ref = jnp.maximum(h_ref, 0.0)
    ref_bf16 = (jnp.dot(h_ref.astype(jnp.bfloat16), w2.astype(jnp.bfloat16),
                        preferred_element_type=jnp.float32) + b2
                ).astype(jnp.bfloat16).astype(jnp.float32)
    assert jnp.allclose(logits, ref_bf16, atol=2e-2, rtol=2e-2)

    # Looser sanity check vs. the pure-f32 torch-equivalent forward.
    ref_f32 = jnp.maximum(x @ w1 + b1, 0.0) @ w2 + b2
    assert jnp.allclose(logits, ref_f32, atol=5e-2, rtol=5e-2)

    print("KERNEL_OK")
</pallas_src>

<mosaic_0001>
module attributes {stable_mosaic.version = 11 : i64} {
  func.func @mlp_kernel(%arg0: i32, %arg1: memref<16x32xbf16, #tpu.memory_space<vmem>>, %arg2: memref<32x128xbf16, #tpu.memory_space<vmem>>, %arg3: memref<1x128xf32, #tpu.memory_space<vmem>>, %arg4: memref<128x128xbf16, #tpu.memory_space<vmem>>, %arg5: memref<1x128xf32, #tpu.memory_space<vmem>>, %arg6: memref<16x128xbf16, #tpu.memory_space<vmem>>) attributes {dimension_semantics = [#tpu.dimension_semantics<parallel>], iteration_bounds = array<i64: 1>, scalar_prefetch = 0 : i64, scratch_operands = 0 : i64, tpu.core_type = #tpu.core_type<tc>, window_params = [{transform_indices = @transform_0, window_bounds = array<i64: 16, 32>}, {pipeline_mode = #tpu.pipeline_mode<synchronous>, transform_indices = @transform_1, window_bounds = array<i64: 32, 128>}, {pipeline_mode = #tpu.pipeline_mode<synchronous>, transform_indices = @transform_2, window_bounds = array<i64: 1, 128>}, {pipeline_mode = #tpu.pipeline_mode<synchronous>, transform_indices = @transform_3, window_bounds = array<i64: 128, 128>}, {pipeline_mode = #tpu.pipeline_mode<synchronous>, transform_indices = @transform_4, window_bounds = array<i64: 1, 128>}, {transform_indices = @transform_5, window_bounds = array<i64: 16, 128>}]} {
    %c0 = arith.constant 0 : index
    %c0_0 = arith.constant 0 : index
    %0 = vector.load %arg1[%c0, %c0_0] : memref<16x32xbf16, #tpu.memory_space<vmem>>, vector<16x32xbf16>
    %c0_1 = arith.constant 0 : index
    %c0_2 = arith.constant 0 : index
    %1 = vector.load %arg2[%c0_1, %c0_2] : memref<32x128xbf16, #tpu.memory_space<vmem>>, vector<32x128xbf16>
    %cst = arith.constant dense<0.000000e+00> : vector<16x128xf32>
    %2 = tpu.matmul %0, %1, %cst {dimension_numbers = #tpu.dot_dimension_numbers<[1], [0], [0], [1], [0, 0, 1, 1], [], []>} : vector<16x32xbf16>, vector<32x128xbf16>, vector<16x128xf32> -> vector<16x128xf32>
    %c0_3 = arith.constant 0 : index
    %c0_4 = arith.constant 0 : index
    %3 = vector.load %arg3[%c0_3, %c0_4] : memref<1x128xf32, #tpu.memory_space<vmem>>, vector<1x128xf32>
    %4 = vector.broadcast %3 : vector<1x128xf32> to vector<16x128xf32>
    %5 = arith.addf %2, %4 : vector<16x128xf32>
    %cst_5 = arith.constant 0.000000e+00 : f32
    %6 = vector.broadcast %cst_5 : f32 to vector<16x128xf32>
    %7 = arith.maximumf %5, %6 : vector<16x128xf32>
    %8 = arith.truncf %7 : vector<16x128xf32> to vector<16x128xbf16>
    %c0_6 = arith.constant 0 : index
    %c0_7 = arith.constant 0 : index
    %9 = vector.load %arg4[%c0_6, %c0_7] : memref<128x128xbf16, #tpu.memory_space<vmem>>, vector<128x128xbf16>
    %cst_8 = arith.constant dense<0.000000e+00> : vector<16x128xf32>
    %10 = tpu.matmul %8, %9, %cst_8 {dimension_numbers = #tpu.dot_dimension_numbers<[1], [0], [0], [1], [0, 0, 1, 1], [], []>} : vector<16x128xbf16>, vector<128x128xbf16>, vector<16x128xf32> -> vector<16x128xf32>
    %c0_9 = arith.constant 0 : index
    %c0_10 = arith.constant 0 : index
    %11 = vector.load %arg5[%c0_9, %c0_10] : memref<1x128xf32, #tpu.memory_space<vmem>>, vector<1x128xf32>
    %12 = vector.broadcast %11 : vector<1x128xf32> to vector<16x128xf32>
    %13 = arith.addf %10, %12 : vector<16x128xf32>
    %14 = arith.truncf %13 : vector<16x128xf32> to vector<16x128xbf16>
    %c0_11 = arith.constant 0 : index
    %c0_12 = arith.constant 0 : index
    %15 = vector.load %arg6[%c0_11, %c0_12] : memref<16x128xbf16, #tpu.memory_space<vmem>>, vector<16x128xbf16>
    tpu.vector_store %arg6[%c0_11, %c0_12], %14 {strides = array<i32>} : memref<16x128xbf16, #tpu.memory_space<vmem>>, vector<16x128xbf16>,
    return
  }
  func.func @transform_0(%arg0: i32) -> (i32, i32) {
    %c0_i32 = arith.constant 0 : i32
    %c0_i32_0 = arith.constant 0 : i32
    return %arg0, %c0_i32 : i32, i32
  }
  func.func @transform_1(%arg0: i32) -> (i32, i32) {
    %c0_i32 = arith.constant 0 : i32
    %c0_i32_0 = arith.constant 0 : i32
    %c0_i32_1 = arith.constant 0 : i32
    return %c0_i32, %c0_i32_0 : i32, i32
  }
  func.func @transform_2(%arg0: i32) -> (i32, i32) {
    %c0_i32 = arith.constant 0 : i32
    %c0_i32_0 = arith.constant 0 : i32
    %c0_i32_1 = arith.constant 0 : i32
    return %c0_i32, %c0_i32_0 : i32, i32
  }
  func.func @transform_3(%arg0: i32) -> (i32, i32) {
    %c0_i32 = arith.constant 0 : i32
    %c0_i32_0 = arith.constant 0 : i32
    %c0_i32_1 = arith.constant 0 : i32
    return %c0_i32, %c0_i32_0 : i32, i32
  }
  func.func @transform_4(%arg0: i32) -> (i32, i32) {
    %c0_i32 = arith.constant 0 : i32
    %c0_i32_0 = arith.constant 0 : i32
    %c0_i32_1 = arith.constant 0 : i32
    return %c0_i32, %c0_i32_0 : i32, i32
  }
  func.func @transform_5(%arg0: i32) -> (i32, i32) {
    %c0_i32 = arith.constant 0 : i32
    %c0_i32_0 = arith.constant 0 : i32
    return %arg0, %c0_i32 : i32, i32
  }
}

</mosaic_0001>

<bundles_post_ra>
// kernel: _forward_padded.1
= control target key start
LH: loop header
LB: loop body
LE: loop exit
PB: predicated region body
PF: predicated region fallthrough
CT: control target
= control target key end

     0   :  { %10 = vsyncpa [#allocation3], 0  ;;  %s343_s18 = smov [#allocation2]   ;;  %s408_s0 = inlined_call_operand.vmem [shape: bf16[16,32], index: 0, kind: input, shape index: {}]   ;;  %s409_s1 = inlined_call_operand.vmem [shape: bf16[32,128], index: 1, kind: input, shape index: {}]   ;;  %s410_s2 = inlined_call_operand.vmem [shape: f32[1,128], index: 2, kind: input, shape index: {}]   ;;  %s411_s3 = inlined_call_operand.hbm [shape: bf16[128,128], index: 3, kind: input, shape index: {}]   ;;  %s412_s4 = inlined_call_operand.vmem [shape: f32[1,128], index: 4, kind: input, shape index: {}]   ;;  %s413_s5 = inlined_call_operand.vmem [shape: bf16[16,128], index: 5, kind: output, shape index: {}]  }
   0x1   :  { %s22_s19 = sshll.u32 %s343_s18, 4  ;;  %s319_s22 = scalar_lea.hbm %s411_s3, 1024  ;;  %s23_s19 = int_to_ptr.vmem [resolvable:$true] %s22_s19 }
   0x2   :  { %p320_p0 = scmp.ne.s32.totalorder %s411_s3, %s319_s22  ;;  %p323_p1 = scmp.lt.u32.totalorder %s319_s22, %s411_s3 }
   0x4   :  { %p325_p2 = pnand %p323_p1, %p320_p0 }
   0x6   :  { %328 = shalt.err (!%p325_p2)
}
   0x7   :  { %s329_s27 = scalar_lea.vmem %s23_s19, 1024  ;;  %p334_p4 = scmp.lt.s32.totalorder %s23_s19, %s23_s19 }
   0x8   :  { %p330_p3 = scmp.ne.s32.totalorder %s23_s19, %s329_s27  ;;  %p335_p5 = scmp.lt.s32.totalorder %s329_s27, %s329_s27 }
   0xa   :  { %p336_p6 = por %p335_p5, %p334_p4 }
   0xc   :  { %p337_p7 = pnand %p336_p6, %p330_p3 }
   0xe   :  { %340 = shalt.err (!%p337_p7)
}
   0xf   :  { %s344_s28 = smov 64   ;;  %s345_s29 = smov 4  }
  0x10   :  { %28 = dma.hbm_to_vmem [thread:$0]  %s411_s3, 1024, %s23_s19, [#allocation3], %s344_s28, %s344_s28, %s345_s29  }
  0x11   :  { %341 = dma.done.wait [#allocation3], 1024  }
  0x12   :  { %342 = vsyncadd [#allocation3], 4294966272  ;;  %v346_v0 = vmov 0.0   ;;  %vm347_vm0 = vmmov 0   ;;  %v308_v1 = vld [vmem:[%s409_s1] sm:$0xff]   ;;  %v309_v2 = vld [vmem:[%s409_s1 + $0x8] sm:$0xff]  }
  0x13   :  { %275 = vmatprep.subr.bf16.mxu0 %v346_v0  ;;  %279 = vmatprep.mubr.msk.bf16.mxu0 %vm347_vm0, %v346_v0  ;;  %v311_v3 = vld [vmem:[#allocation2] sm:$0xff]   ;;  %v310_v4 = vld [vmem:[%s408_s0] sm:$0xff]   ;;  %v312_v5 = vld [vmem:[#allocation2 + $0x8] sm:$0xff]   ;;  %vm65_vm1 = vcmask 261120  }
  0x14   :  { %283 = vmatprep.subr.bf16.mxu1 %v346_v0  ;;  %299 = vmatprep.mubr.msk.bf16.mxu1 %vm347_vm0, %v346_v0  ;;  %v313_v6 = vld [vmem:[#allocation2 + $0x10] sm:$0xff]   ;;  %v314_v7 = vld [vmem:[#allocation2 + $0x18] sm:$0xff]   ;;  %v315_v8 = vld [vmem:[#allocation2 + $0x20] sm:$0xff]  }
  0x15   :  { %276 = vmatpush3.bf16.msra.mxu0 %v308_v1  ;;  %284 = vmatpush3.bf16.msra.mxu1 %v311_v3  ;;  %v316_v9 = vld [vmem:[#allocation2 + $0x28] sm:$0xff]   ;;  %v317_v10 = vld [vmem:[#allocation2 + $0x30] sm:$0xff]   ;;  %v318_v11 = vld [vmem:[#allocation2 + $0x38] sm:$0xff]  }
  0x16   :  { %277 = vmatprep.subr.bf16.mxu0 %v346_v0  ;;  %285 = vmatprep.subr.bf16.mxu1 %v346_v0  ;;  %v240_v12 = vld [vmem:[%s410_s2] ss:$0 sm:$0xff] }
  0x17   :  { %v245_v22 = vld [vmem:[%s412_s4] ss:$0 sm:$0xff] }
  0x19   :  { %278 = vmatpush3.bf16.msra.mxu0 %v309_v2  ;;  %286 = vmatpush3.bf16.msra.mxu1 %v312_v5 }
  0x1a   :  { %287 = vmatprep.subr.bf16.mxu1 %v346_v0 }
  0x1c   :  { %280 = vmatmul.mubr.msk.bf16.vlgmr.msra.gmra.mrb[0].mxu0 %vm65_vm1, %v310_v4 }
  0x1d   :  { %288 = vmatpush3.bf16.msra.mxu1 %v313_v6 }
  0x1e   :  { %289 = vmatprep.subr.bf16.mxu1 %v346_v0 }
  0x21   :  { %290 = vmatpush3.bf16.msra.mxu1 %v314_v7 }
  0x22   :  { %291 = vmatprep.subr.bf16.mxu1 %v346_v0 }
  0x25   :  { %292 = vmatpush3.bf16.msra.mxu1 %v315_v8 }
  0x26   :  { %293 = vmatprep.subr.bf16.mxu1 %v346_v0 }
  0x29   :  { %294 = vmatpush3.bf16.msra.mxu1 %v316_v9 }
  0x2a   :  { %295 = vmatprep.subr.bf16.mxu1 %v346_v0 }
  0x2d   :  { %296 = vmatpush3.bf16.msra.mxu1 %v317_v10 }
  0x2e   :  { %297 = vmatprep.subr.bf16.mxu1 %v346_v0 }
  0x31   :  { %298 = vmatpush3.bf16.msra.mxu1 %v318_v11 }
  0xef   :  { %v103_v13 = vpop.f32.mrb[0].mxu0 }
  0xf0   :  { %v104_v14 = vadd.f32 %v240_v12, %v103_v13  ;;  %v281_v15 = vpop.f32.mrb[1].mxu0 }
  0xf1   :  { %v106_v16 = vpop.f32.mrb[2].mxu0 }
  0xf2   :  { %v107_v17 = vadd.f32 %v240_v12, %v106_v16  ;;  %v282_v18 = vpop.f32.mrb[3].mxu0  ;;  %v110_v19 = vmax.f32 %v104_v14, 0.0 }
  0xf4   :  { %v111_v20 = vmax.f32 %v107_v17, 0.0 }
  0xf6   :  { %v112_v21 = vpack.c.bf16 %v111_v20, %v110_v19 }
  0xf8   :  { %300 = vmatmul.mubr.bf16.vlgmr.msra.gmra.mrb[0].mxu1 %v112_v21 }
 0x1cb   :  { %v218_v23 = vpop.f32.mrb[0].mxu1 }
 0x1cc   :  { %v301_v24 = vpop.f32.mrb[1].mxu1  ;;  %v219_v26 = vadd.f32 %v245_v22, %v218_v23 }
 0x1cd   :  { %v221_v25 = vpop.f32.mrb[2].mxu1 }
 0x1ce   :  { %v222_v27 = vadd.f32 %v245_v22, %v221_v25  ;;  %v302_v28 = vpop.f32.mrb[3].mxu1 }
 0x1d0   :  { %v261_v29 = vpack.c.bf16 %v222_v27, %v219_v26 }
 0x1d2   :  { %262 = vst [vmem:[%s413_s5] sm:$0xff] %v261_v29  }
 0x1d3   :  { %239 = vsyncpa [#allocation3], 1 }

</bundles_post_ra>
